<compile_context>
chip_gen: v7x
topology: tpu7x:2x2x1
jax: 0.10.0
libtpu: 0.0.40
codegen_flags: <defaults>
</compile_context>

<pallas_src>
import functools

import jax
import jax.numpy as jnp
from jax.experimental import pallas as pl
from jax.experimental.pallas import tpu as pltpu

LN_EPS = 1e-12  # BERT LayerNorm epsilon


# ----------------------------------------------------------------------------
# tiling helper
# ----------------------------------------------------------------------------
def _pick_tile(dim, cap, multiple):
    """Largest tile <= cap that divides `dim` and is a multiple of `multiple`
    (or the full dim if none / dim already small)."""
    if dim <= cap:
        return dim
    for d in range(cap - cap % multiple, multiple - 1, -multiple):
        if dim % d == 0:
            return d
    return dim


# ----------------------------------------------------------------------------
# Pallas kernels
# ----------------------------------------------------------------------------
def _dense_kernel(x_ref, w_ref, b_ref, o_ref, acc_ref, *, activation):
    """Tiled matmul + bias + activation. K axis is the reduction (last grid axis)."""
    k = pl.program_id(2)

    @pl.when(k == 0)
    def _():
        acc_ref[...] = jnp.zeros_like(acc_ref)

    acc_ref[...] += jnp.dot(x_ref[...].astype(jnp.bfloat16), w_ref[...],
                            preferred_element_type=jnp.float32)

    @pl.when(k == pl.num_programs(2) - 1)
    def _():
        acc = acc_ref[...] + b_ref[...]
        if activation == "gelu":
            # TODO(synk): HF bert-base-cased uses exact erf GELU; tanh approximation
            # is used here (erf lowering support in Mosaic is not guaranteed).
            acc = 0.5 * acc * (1.0 + jnp.tanh(
                0.7978845608028654 * (acc + 0.044715 * acc * acc * acc)))
        elif activation == "tanh":
            acc = jnp.tanh(acc)
        o_ref[...] = acc.astype(o_ref.dtype)


def dense(x, w, b, activation="none", *, tm_cap=256, tn_cap=1024, tk_cap=512):
    """x:(M,K) f32 @ w:(K,N) bf16 + b:(N,) f32 -> (M,N) f32, fused activation."""
    M, K = x.shape
    K2, N = w.shape
    assert K == K2
    tm = _pick_tile(M, tm_cap, 8)
    tn = _pick_tile(N, tn_cap, 128)
    tk = _pick_tile(K, tk_cap, 128)
    kernel = functools.partial(_dense_kernel, activation=activation)
    return pl.pallas_call(
        kernel,
        out_shape=jax.ShapeDtypeStruct((M, N), jnp.float32),
        grid=(M // tm, N // tn, K // tk),
        in_specs=[
            pl.BlockSpec((tm, tk), lambda i, j, k: (i, k)),
            pl.BlockSpec((tk, tn), lambda i, j, k: (k, j)),
            pl.BlockSpec((1, tn), lambda i, j, k: (0, j)),
        ],
        out_specs=pl.BlockSpec((tm, tn), lambda i, j, k: (i, j)),
        scratch_shapes=[pltpu.VMEM((tm, tn), jnp.float32)],
        compiler_params=pltpu.CompilerParams(
            dimension_semantics=("parallel", "parallel", "arbitrary")),
    )(x, w, b.reshape(1, N))


def _dense_add_ln_kernel(x_ref, w_ref, b_ref, r_ref, g_ref, bb_ref, o_ref, acc_ref):
    """Tiled matmul with fused bias + residual-add + LayerNorm epilogue.
    N (hidden) is kept full so the LN statistics see the whole row."""
    k = pl.program_id(1)

    @pl.when(k == 0)
    def _():
        acc_ref[...] = jnp.zeros_like(acc_ref)

    acc_ref[...] += jnp.dot(x_ref[...].astype(jnp.bfloat16), w_ref[...],
                            preferred_element_type=jnp.float32)

    @pl.when(k == pl.num_programs(1) - 1)
    def _():
        y = acc_ref[...] + b_ref[...] + r_ref[...]
        mean = jnp.mean(y, axis=-1, keepdims=True)
        yc = y - mean
        var = jnp.mean(yc * yc, axis=-1, keepdims=True)
        out = yc * jax.lax.rsqrt(var + LN_EPS)
        o_ref[...] = (out * g_ref[...] + bb_ref[...]).astype(o_ref.dtype)


def dense_add_layernorm(x, w, b, residual, gamma, beta, *, tm_cap=256, tk_cap=512):
    """LayerNorm(x @ w + b + residual) fused in one pallas_call."""
    M, K = x.shape
    K2, N = w.shape
    assert K == K2 and residual.shape == (M, N)
    tm = _pick_tile(M, tm_cap, 8)
    tk = _pick_tile(K, tk_cap, 128)
    return pl.pallas_call(
        _dense_add_ln_kernel,
        out_shape=jax.ShapeDtypeStruct((M, N), jnp.float32),
        grid=(M // tm, K // tk),
        in_specs=[
            pl.BlockSpec((tm, tk), lambda i, k: (i, k)),
            pl.BlockSpec((tk, N), lambda i, k: (k, 0)),
            pl.BlockSpec((1, N), lambda i, k: (0, 0)),
            pl.BlockSpec((tm, N), lambda i, k: (i, 0)),
            pl.BlockSpec((1, N), lambda i, k: (0, 0)),
            pl.BlockSpec((1, N), lambda i, k: (0, 0)),
        ],
        out_specs=pl.BlockSpec((tm, N), lambda i, k: (i, 0)),
        scratch_shapes=[pltpu.VMEM((tm, N), jnp.float32)],
        compiler_params=pltpu.CompilerParams(
            dimension_semantics=("parallel", "arbitrary")),
    )(x, w, b.reshape(1, N), residual, gamma.reshape(1, N), beta.reshape(1, N))


def _ln_kernel(x_ref, g_ref, b_ref, o_ref):
    x = x_ref[...]
    mean = jnp.mean(x, axis=-1, keepdims=True)
    xc = x - mean
    var = jnp.mean(xc * xc, axis=-1, keepdims=True)
    y = xc * jax.lax.rsqrt(var + LN_EPS)
    o_ref[...] = (y * g_ref[...] + b_ref[...]).astype(o_ref.dtype)


def layernorm(x, gamma, beta, *, tm_cap=512):
    """LayerNorm over the last axis (no residual — embedding path)."""
    M, H = x.shape
    tm = _pick_tile(M, tm_cap, 8)
    return pl.pallas_call(
        _ln_kernel,
        out_shape=jax.ShapeDtypeStruct((M, H), jnp.float32),
        grid=(M // tm,),
        in_specs=[
            pl.BlockSpec((tm, H), lambda i: (i, 0)),
            pl.BlockSpec((1, H), lambda i: (0, 0)),
            pl.BlockSpec((1, H), lambda i: (0, 0)),
        ],
        out_specs=pl.BlockSpec((tm, H), lambda i: (i, 0)),
        compiler_params=pltpu.CompilerParams(dimension_semantics=("parallel",)),
    )(x, gamma.reshape(1, H), beta.reshape(1, H))


def _mha_kernel(qkv_ref, o_ref, *, heads, head_dim, scale):
    """All heads of one batch element per grid step. Consumes the fused QKV slab
    (S, 3H) directly; writes one lane-dense (S, H) context block."""
    H = heads * head_dim
    qkv = qkv_ref[0]                       # (S, 3H) f32
    outs = []
    for h in range(heads):                 # static unroll over heads
        lo = h * head_dim
        qh = qkv[:, lo:lo + head_dim].astype(jnp.bfloat16)
        kh = qkv[:, H + lo:H + lo + head_dim].astype(jnp.bfloat16)
        vh = qkv[:, 2 * H + lo:2 * H + lo + head_dim].astype(jnp.bfloat16)
        # scores = q @ k^T over head_dim; all tokens attended (HF default mask)
        s = jax.lax.dot_general(qh, kh, (((1,), (1,)), ((), ())),
                                preferred_element_type=jnp.float32) * scale
        s = s - jnp.max(s, axis=-1, keepdims=True)
        p = jnp.exp(s)
        p = p * pl.reciprocal(jnp.sum(p, axis=-1, keepdims=True), approx=True)
        outs.append(jnp.dot(p.astype(jnp.bfloat16), vh,
                            preferred_element_type=jnp.float32))
    o_ref[0] = jnp.concatenate(outs, axis=-1).astype(o_ref.dtype)


def multihead_attention(qkv, B, S, heads, head_dim):
    """qkv: (B*S, 3H) fused projection output -> context (B*S, H)."""
    H = heads * head_dim
    kernel = functools.partial(_mha_kernel, heads=heads, head_dim=head_dim,
                               scale=1.0 / float(head_dim) ** 0.5)
    ctx = pl.pallas_call(
        kernel,
        out_shape=jax.ShapeDtypeStruct((B, S, H), jnp.float32),
        grid=(B,),
        in_specs=[pl.BlockSpec((1, S, 3 * H), lambda b: (b, 0, 0))],
        out_specs=pl.BlockSpec((1, S, H), lambda b: (b, 0, 0)),
        compiler_params=pltpu.CompilerParams(dimension_semantics=("parallel",)),
    )(qkv.reshape(B, S, 3 * H))
    return ctx.reshape(B * S, H)


# ----------------------------------------------------------------------------
# Synthetic BERT parameters (deterministic); matmul weights stored in bf16
# ----------------------------------------------------------------------------
def make_params(key, *, vocab, hidden, heads, intermediate, layers, max_pos,
                type_vocab=2, std=0.02):
    def nrm(k, shape, dtype=jnp.float32):
        return (std * jax.random.normal(k, shape)).astype(dtype)

    keys = iter(jax.random.split(key, 8 + 8 * layers))
    p = {
        "word_emb": nrm(next(keys), (vocab, hidden)),
        "pos_emb": nrm(next(keys), (max_pos, hidden)),
        "type_emb": nrm(next(keys), (type_vocab, hidden)),
        "emb_ln_g": jnp.ones((hidden,), jnp.float32),
        "emb_ln_b": jnp.zeros((hidden,), jnp.float32),
        "pool_w": nrm(next(keys), (hidden, hidden), jnp.bfloat16),
        "pool_b": jnp.zeros((hidden,), jnp.float32),
        "layers": [],
    }
    for _ in range(layers):
        p["layers"].append({
            # Fused QKV projection: wq|wk|wv concatenated along the output dim.
            "wqkv": nrm(next(keys), (hidden, 3 * hidden), jnp.bfloat16),
            "bqkv": jnp.zeros((3 * hidden,), jnp.float32),
            "wo": nrm(next(keys), (hidden, hidden), jnp.bfloat16),
            "bo": jnp.zeros((hidden,), jnp.float32),
            "ln1_g": jnp.ones((hidden,), jnp.float32),
            "ln1_b": jnp.zeros((hidden,), jnp.float32),
            "w1": nrm(next(keys), (hidden, intermediate), jnp.bfloat16),
            "b1": jnp.zeros((intermediate,), jnp.float32),
            "w2": nrm(next(keys), (intermediate, hidden), jnp.bfloat16),
            "b2": jnp.zeros((hidden,), jnp.float32),
            "ln2_g": jnp.ones((hidden,), jnp.float32),
            "ln2_b": jnp.zeros((hidden,), jnp.float32),
        })
    return p


# ----------------------------------------------------------------------------
# BERTEncoder.forward equivalent
# ----------------------------------------------------------------------------
def bert_encoder_forward(params, input_ids, *, heads, head_dim):
    B, S = input_ids.shape
    H = heads * head_dim

    # Embedding lookups stay as XLA gathers (glue); LayerNorm runs in Pallas.
    emb = (params["word_emb"][input_ids]
           + params["pos_emb"][:S][None, :, :]
           + params["type_emb"][0][None, None, :])                # (B, S, H)
    x = layernorm(emb.reshape(B * S, H), params["emb_ln_g"], params["emb_ln_b"])

    for lp in params["layers"]:
        qkv = dense(x, lp["wqkv"], lp["bqkv"])                    # (B*S, 3H)
        ctx = multihead_attention(qkv, B, S, heads, head_dim)     # (B*S, H)
        x = dense_add_layernorm(ctx, lp["wo"], lp["bo"],
                                x, lp["ln1_g"], lp["ln1_b"])      # attn out + LN1
        ffn = dense(x, lp["w1"], lp["b1"], activation="gelu")     # (B*S, 4H)
        x = dense_add_layernorm(ffn, lp["w2"], lp["b2"],
                                x, lp["ln2_g"], lp["ln2_b"])      # ffn down + LN2

    seq_out = x.reshape(B, S, H)                                  # (B, S, H)
    cls = seq_out[:, 0, :]                                        # (B, H)
    pooled = dense(cls, params["pool_w"], params["pool_b"], activation="tanh")

    output = jnp.transpose(seq_out, (1, 0, 2))                    # output.permute(1,0,2)
    hidden = pooled[None, :, :]                                   # hidden.unsqueeze(0)
    cell_state = jnp.zeros_like(hidden)                           # torch.zeros(hidden.shape)
    return output, (hidden, cell_state)


if __name__ == "__main__":
    # Small config consistent with the module (hidden_dim == 768 is asserted).
    VOCAB, HIDDEN, HEADS, HEAD_DIM = 1000, 768, 12, 64
    INTERMEDIATE, MAX_POS = 3072, 64
    # TODO(synk): real bert-base-cased has 12 layers / 28996 vocab and
    # pretrained weights; reduced to 2 layers with synthetic init here.
    LAYERS = 2
    B, S = 2, 8

    key = jax.random.PRNGKey(0)
    pkey, ikey = jax.random.split(key)
    params = make_params(pkey, vocab=VOCAB, hidden=HIDDEN, heads=HEADS,
                         intermediate=INTERMEDIATE, layers=LAYERS, max_pos=MAX_POS)
    encoder_input = jax.random.randint(ikey, (B, S), 0, VOCAB, dtype=jnp.int32)

    output, (hidden, cell_state) = bert_encoder_forward(
        params, encoder_input, heads=HEADS, head_dim=HEAD_DIM)
    jax.block_until_ready((output, hidden, cell_state))

    assert output.shape == (S, B, HIDDEN)
    assert hidden.shape == (1, B, HIDDEN)
    assert cell_state.shape == (1, B, HIDDEN)
    assert bool(jnp.all(cell_state == 0.0))
    assert bool(jnp.all(jnp.isfinite(output))) and bool(jnp.all(jnp.isfinite(hidden)))
    print("KERNEL_OK")
</pallas_src>

<mosaic_0001>
module attributes {stable_mosaic.version = 11 : i64} {
  func.func @_ln_kernel(%arg0: i32, %arg1: memref<16x768xf32, #tpu.memory_space<vmem>>, %arg2: memref<1x768xf32, #tpu.memory_space<vmem>>, %arg3: memref<1x768xf32, #tpu.memory_space<vmem>>, %arg4: memref<16x768xf32, #tpu.memory_space<vmem>>) attributes {dimension_semantics = [#tpu.dimension_semantics<parallel>], iteration_bounds = array<i64: 1>, scalar_prefetch = 0 : i64, scratch_operands = 0 : i64, tpu.core_type = #tpu.core_type<tc>, window_params = [{transform_indices = @transform_0, window_bounds = array<i64: 16, 768>}, {pipeline_mode = #tpu.pipeline_mode<synchronous>, transform_indices = @transform_1, window_bounds = array<i64: 1, 768>}, {pipeline_mode = #tpu.pipeline_mode<synchronous>, transform_indices = @transform_2, window_bounds = array<i64: 1, 768>}, {transform_indices = @transform_3, window_bounds = array<i64: 16, 768>}]} {
    %c0 = arith.constant 0 : index
    %c0_0 = arith.constant 0 : index
    %0 = vector.load %arg1[%c0, %c0_0] : memref<16x768xf32, #tpu.memory_space<vmem>>, vector<16x768xf32>
    %cst = arith.constant dense<0.000000e+00> : vector<16xf32>
    %1 = vector.multi_reduction <add>, %0, %cst [1] : vector<16x768xf32> to vector<16xf32>
    %2 = vector.shape_cast %1 : vector<16xf32> to vector<16x1xf32>
    %cst_1 = arith.constant 7.680000e+02 : f32
    %3 = vector.broadcast %cst_1 : f32 to vector<16x1xf32>
    %4 = arith.divf %2, %3 : vector<16x1xf32>
    %5 = vector.broadcast %4 : vector<16x1xf32> to vector<16x768xf32>
    %6 = arith.subf %0, %5 : vector<16x768xf32>
    %7 = arith.mulf %6, %6 : vector<16x768xf32>
    %cst_2 = arith.constant dense<0.000000e+00> : vector<16xf32>
    %8 = vector.multi_reduction <add>, %7, %cst_2 [1] : vector<16x768xf32> to vector<16xf32>
    %9 = vector.shape_cast %8 : vector<16xf32> to vector<16x1xf32>
    %cst_3 = arith.constant 7.680000e+02 : f32
    %10 = vector.broadcast %cst_3 : f32 to vector<16x1xf32>
    %11 = arith.divf %9, %10 : vector<16x1xf32>
    %cst_4 = arith.constant 9.99999996E-13 : f32
    %12 = vector.broadcast %cst_4 : f32 to vector<16x1xf32>
    %13 = arith.addf %11, %12 : vector<16x1xf32>
    %14 = math.rsqrt %13 : vector<16x1xf32>
    %15 = vector.broadcast %14 : vector<16x1xf32> to vector<16x768xf32>
    %16 = arith.mulf %6, %15 : vector<16x768xf32>
    %c0_5 = arith.constant 0 : index
    %c0_6 = arith.constant 0 : index
    %17 = vector.load %arg2[%c0_5, %c0_6] : memref<1x768xf32, #tpu.memory_space<vmem>>, vector<1x768xf32>
    %18 = vector.broadcast %17 : vector<1x768xf32> to vector<16x768xf32>
    %19 = arith.mulf %16, %18 : vector<16x768xf32>
    %c0_7 = arith.constant 0 : index
    %c0_8 = arith.constant 0 : index
    %20 = vector.load %arg3[%c0_7, %c0_8] : memref<1x768xf32, #tpu.memory_space<vmem>>, vector<1x768xf32>
    %21 = vector.broadcast %20 : vector<1x768xf32> to vector<16x768xf32>
    %22 = arith.addf %19, %21 : vector<16x768xf32>
    %c0_9 = arith.constant 0 : index
    %c0_10 = arith.constant 0 : index
    %23 = vector.load %arg4[%c0_9, %c0_10] : memref<16x768xf32, #tpu.memory_space<vmem>>, vector<16x768xf32>
    tpu.vector_store %arg4[%c0_9, %c0_10], %22 {strides = array<i32>} : memref<16x768xf32, #tpu.memory_space<vmem>>, vector<16x768xf32>,
    return
  }
  func.func @transform_0(%arg0: i32) -> (i32, i32) {
    %c0_i32 = arith.constant 0 : i32
    %c0_i32_0 = arith.constant 0 : i32
    return %arg0, %c0_i32 : i32, i32
  }
  func.func @transform_1(%arg0: i32) -> (i32, i32) {
    %c0_i32 = arith.constant 0 : i32
    %c0_i32_0 = arith.constant 0 : i32
    %c0_i32_1 = arith.constant 0 : i32
    return %c0_i32, %c0_i32_0 : i32, i32
  }
  func.func @transform_2(%arg0: i32) -> (i32, i32) {
    %c0_i32 = arith.constant 0 : i32
    %c0_i32_0 = arith.constant 0 : i32
    %c0_i32_1 = arith.constant 0 : i32
    return %c0_i32, %c0_i32_0 : i32, i32
  }
  func.func @transform_3(%arg0: i32) -> (i32, i32) {
    %c0_i32 = arith.constant 0 : i32
    %c0_i32_0 = arith.constant 0 : i32
    return %arg0, %c0_i32 : i32, i32
  }
}

</mosaic_0001>

<bundles_post_ra>
// kernel: tpu_custom_call.1
= control target key start
LH: loop header
LB: loop body
LE: loop exit
PB: predicated region body
PF: predicated region fallthrough
CT: control target
= control target key end

     0   :  { %8 = vsyncpa [#allocation3], 0  ;;  %s440_s0 = inlined_call_operand.hbm [shape: f32[16,768], index: 0, kind: input, shape index: {}]   ;;  %s441_s1 = inlined_call_operand.hbm [shape: f32[1,768], index: 1, kind: input, shape index: {}]   ;;  %s442_s2 = inlined_call_operand.vmem [shape: f32[1,768], index: 2, kind: input, shape index: {}]   ;;  %s443_s3 = inlined_call_operand.hbm [shape: f32[16,768], index: 3, kind: output, shape index: {}]  }
   0x1   :  { %9 = vsyncpa [#allocation6], 0 }
   0x2   :  { %10 = vsyncpa [#allocation4], 0  ;;  %s325_s12 = smov [#allocation2]   ;;  %s253_s16 = scalar_lea.hbm %s440_s0, 1536 }
   0x3   :  { %s16_s13 = sshll.u32 %s325_s12, 4  ;;  %p254_p0 = scmp.ne.s32.totalorder %s440_s0, %s253_s16  ;;  %s17_s13 = int_to_ptr.vmem [resolvable:$true] %s16_s13 }
   0x4   :  { %p257_p1 = scmp.lt.u32.totalorder %s253_s16, %s440_s0 }
   0x6   :  { %p259_p2 = pnand %p257_p1, %p254_p0 }
   0x8   :  { %262 = shalt.err (!%p259_p2)
}
   0x9   :  { %s263_s21 = scalar_lea.vmem %s17_s13, 1536  ;;  %p268_p4 = scmp.lt.s32.totalorder %s17_s13, %s17_s13 }
   0xa   :  { %p264_p3 = scmp.ne.s32.totalorder %s17_s13, %s263_s21  ;;  %p269_p5 = scmp.lt.s32.totalorder %s263_s21, %s263_s21 }
   0xc   :  { %p270_p6 = por %p269_p5, %p268_p4 }
   0xe   :  { %p271_p7 = pnand %p270_p6, %p264_p3 }
  0x10   :  { %274 = shalt.err (!%p271_p7)
}
  0x11   :  { %s326_s22 = smov 768   ;;  %s327_s23 = smov 48  }
  0x12   :  { %22 = dma.hbm_to_vmem [thread:$0]  %s440_s0, 1536, %s17_s13, [#allocation3], %s326_s22, %s326_s22, %s327_s23  }
  0x13   :  { %s328_s26 = smov [#allocation5]   ;;  %s275_s30 = scalar_lea.hbm %s441_s1, 96 }
  0x14   :  { %s29_s27 = sshll.u32 %s328_s26, 4  ;;  %p276_p8 = scmp.ne.s32.totalorder %s441_s1, %s275_s30  ;;  %s30_s27 = int_to_ptr.vmem [resolvable:$true] %s29_s27 }
  0x15   :  { %p279_p9 = scmp.lt.u32.totalorder %s275_s30, %s441_s1 }
  0x17   :  { %p281_p10 = pnand %p279_p9, %p276_p8 }
  0x19   :  { %284 = shalt.err (!%p281_p10)
}
  0x1a   :  { %s285_s8 = scalar_lea.vmem %s30_s27, 96  ;;  %p290_p12 = scmp.lt.s32.totalorder %s30_s27, %s30_s27 }
  0x1b   :  { %p286_p11 = scmp.ne.s32.totalorder %s30_s27, %s285_s8  ;;  %p291_p13 = scmp.lt.s32.totalorder %s285_s8, %s285_s8 }
  0x1d   :  { %p292_p0 = por %p291_p13, %p290_p12 }
  0x1f   :  { %p293_p1 = pnand %p292_p0, %p286_p11 }
  0x21   :  { %296 = shalt.err (!%p293_p1)
}
  0x22   :  { %32 = dma.hbm_to_vmem [thread:$0]  %s441_s1, 96, %s30_s27, [#allocation6]  }
  0x23   :  { %319 = dma.done.wait [#allocation3], 1536  }
  0x24   :  { %320 = vsyncadd [#allocation3], 4294965760 }
  0x25   :  { %321 = dma.done.wait [#allocation6], 96  }
  0x26   :  { %322 = vsyncadd [#allocation6], 4294967200  ;;  %v41_v0 = vld [vmem:[#allocation2] sm:$0xff]  ;;  %v42_v1 = vld [vmem:[#allocation2 + $0x8] sm:$0xff]  ;;  %v128_v62 = vlaneseq }
  0x27   :  { %v43_v2 = vld [vmem:[#allocation2 + $0x10] sm:$0xff]  ;;  %v44_v3 = vld [vmem:[#allocation2 + $0x18] sm:$0xff]  ;;  %v53_v4 = vadd.f32 %v42_v1, %v41_v0  ;;  %v49_v7 = vld [vmem:[#allocation2 + $0x40] sm:$0xff] }
  0x28   :  { %v47_v5 = vld [vmem:[#allocation2 + $0x30] sm:$0xff]  ;;  %v48_v6 = vld [vmem:[#allocation2 + $0x38] sm:$0xff]  ;;  %v45_v10 = vld [vmem:[#allocation2 + $0x20] sm:$0xff] }
  0x29   :  { %v54_v8 = vadd.f32 %v53_v4, %v43_v2  ;;  %v60_v9 = vadd.f32 %v48_v6, %v47_v5  ;;  %v50_v11 = vld [vmem:[#allocation2 + $0x48] sm:$0xff]  ;;  %v51_v15 = vld [vmem:[#allocation2 + $0x50] sm:$0xff]  ;;  %v52_v18 = vld [vmem:[#allocation2 + $0x58] sm:$0xff] }
  0x2a   :  { %v46_v14 = vld [vmem:[#allocation2 + $0x28] sm:$0xff] }
  0x2b   :  { %v55_v12 = vadd.f32 %v54_v8, %v44_v3  ;;  %v61_v13 = vadd.f32 %v60_v9, %v49_v7  ;;  %v126_v8 = vld [vmem:[#allocation5] sm:$0x3f] }
  0x2d   :  { %v56_v16 = vadd.f32 %v55_v12, %v45_v10  ;;  %v62_v17 = vadd.f32 %v61_v13, %v50_v11 }
  0x2f   :  { %v57_v19 = vadd.f32 %v56_v16, %v46_v14  ;;  %v63_v20 = vadd.f32 %v62_v17, %v51_v15 }
  0x31   :  { %58 = vadd.xlane.f32.xlu0 %v57_v19  ;;  %v64_v21 = vadd.f32 %v63_v20, %v52_v18 }
  0x35   :  { %65 = vadd.xlane.f32.xlu0 %v64_v21 }
  0xbe   :  { %v59_v22 = vpop.xlane.xlu0 %58 }
  0xbf   :  { %v68_v23 = vmul.f32 0.0013020834, %v59_v22 }
  0xc1   :  { %v377_v24 = vsub.f32 %v41_v0, %v68_v23  ;;  %v379_v25 = vsub.f32 %v42_v1, %v68_v23  ;;  %v381_v26 = vsub.f32 %v43_v2, %v68_v23  ;;  %v383_v28 = vsub.f32 %v44_v3, %v68_v23 }
  0xc2   :  { %v66_v27 = vpop.xlane.xlu0 %65  ;;  %v74_v32 = vsub.f32 %v45_v10, %v68_v23  ;;  %v75_v38 = vsub.f32 %v46_v14, %v68_v23  ;;  %v129_v2 = vshrl.u32 %v128_v62, 7 }
  0xc3   :  { %v69_v29 = vmul.f32 0.0013020834, %v66_v27  ;;  %v82_v30 = vmul.f32 %v377_v24, %v377_v24  ;;  %v83_v31 = vmul.f32 %v379_v25, %v379_v25  ;;  %v84_v33 = vmul.f32 %v381_v26, %v381_v26 }
  0xc4   :  { %v85_v39 = vmul.f32 %v383_v28, %v383_v28  ;;  %v86_v44 = vmul.f32 %v74_v32, %v74_v32  ;;  %v87_v49 = vmul.f32 %v75_v38, %v75_v38  ;;  %v130_v4 = vsub.s32 0, %v129_v2 }
  0xc5   :  { %v94_v34 = vadd.f32 %v83_v31, %v82_v30  ;;  %v391_v35 = vsub.f32 %v47_v5, %v69_v29  ;;  %v393_v36 = vsub.f32 %v48_v6, %v69_v29  ;;  %v395_v37 = vsub.f32 %v49_v7, %v69_v29 }
  0xc6   :  { %v399_v41 = vsub.f32 %v50_v11, %v69_v29  ;;  %v405_v46 = vsub.f32 %v51_v15, %v69_v29  ;;  %v81_v51 = vsub.f32 %v52_v18, %v69_v29  ;;  %v134_v5 = vsub.s32 1, %v129_v2  ;;  %v170_v11 = vld [vmem:[%s442_s2] sm:$0x3f]  ;;  %s329_s2 = smov [#allocation7]  }
  0xc7   :  { %v95_v40 = vadd.f32 %v94_v34, %v84_v33  ;;  %v88_v42 = vmul.f32 %v391_v35, %v391_v35  ;;  %v89_v43 = vmul.f32 %v393_v36, %v393_v36  ;;  %v90_v47 = vmul.f32 %v395_v37, %v395_v37  ;;  %s231_s11 = sshll.u32 %s329_s2, 4  ;;  %s232_s11 = int_to_ptr.vmem [resolvable:$true] %s231_s11 }
  0xc8   :  { %v91_v52 = vmul.f32 %v399_v41, %v399_v41  ;;  %v92_v55 = vmul.f32 %v405_v46, %v405_v46  ;;  %v93_v57 = vmul.f32 %v81_v51, %v81_v51  ;;  %v138_v6 = vsub.s32 2, %v129_v2  ;;  %s297_s12 = scalar_lea.vmem %s232_s11, 1536  ;;  %p302_p3 = scmp.lt.s32.totalorder %s232_s11, %s232_s11 }
  0xc9   :  { %v96_v45 = vadd.f32 %v95_v40, %v85_v39  ;;  %v101_v48 = vadd.f32 %v89_v43, %v88_v42  ;;  %v142_v7 = vsub.s32 3, %v129_v2  ;;  %v146_v9 = vsub.s32 4, %v129_v2  ;;  %p298_p2 = scmp.ne.s32.totalorder %s232_s11, %s297_s12  ;;  %p303_p4 = scmp.lt.s32.totalorder %s297_s12, %s297_s12 }
  0xca   :  { %v150_v10 = vsub.s32 5, %v129_v2  ;;  %v131_v12 = vrot.slane %v126_v8, %v130_v4  ;;  %v135_v13 = vrot.slane %v126_v8, %v134_v5  ;;  %v139_v14 = vrot.slane %v126_v8, %v138_v6 }
  0xcb   :  { %v97_v50 = vadd.f32 %v96_v45, %v86_v44  ;;  %v102_v53 = vadd.f32 %v101_v48, %v90_v47  ;;  %v143_v15 = vrot.slane %v126_v8, %v142_v7  ;;  %v147_v17 = vrot.slane %v126_v8, %v146_v9  ;;  %p304_p5 = por %p303_p4, %p302_p3 }
  0xcc   :  { %v151_v18 = vrot.slane %v126_v8, %v150_v10  ;;  %v175_v19 = vrot.slane %v170_v11, %v130_v4  ;;  %v179_v20 = vrot.slane %v170_v11, %v134_v5  ;;  %v183_v31 = vrot.slane %v170_v11, %v138_v6 }
  0xcd   :  { %v98_v54 = vadd.f32 %v97_v50, %v87_v49  ;;  %v103_v56 = vadd.f32 %v102_v53, %v91_v52  ;;  %v187_v33 = vrot.slane %v170_v11, %v142_v7  ;;  %v191_v40 = vrot.slane %v170_v11, %v146_v9  ;;  %p305_p6 = pnand %p304_p5, %p298_p2 }
  0xce   :  { %v195_v42 = vrot.slane %v170_v11, %v150_v10 }
  0xcf   :  { %99 = vadd.xlane.f32.xlu1 %v98_v54  ;;  %v104_v58 = vadd.f32 %v103_v56, %v92_v55 }
  0xd1   :  { %v105_v59 = vadd.f32 %v104_v58, %v93_v57 }
  0xd3   :  { %106 = vadd.xlane.f32.xlu1 %v105_v59 }
 0x15c   :  { %v100_v60 = vpop.xlane.xlu1 %99 }
 0x15d   :  { %v108_v61 = vmul.f32 0.0013020834, %v100_v60 }
 0x15f   :  { %v110_v63 = vadd.f32 1e-12, %v108_v61 }
 0x160   :  { %v107_v0 = vpop.xlane.xlu1 %106 }
 0x161   :  { %249 = vrsqrt.f32 %v110_v63  ;;  %v109_v1 = vmul.f32 0.0013020834, %v107_v0 }
 0x163   :  { %v111_v3 = vadd.f32 1e-12, %v109_v1 }
 0x165   :  { %251 = vrsqrt.f32 %v111_v3 }
 0x16b   :  { %v250_v16 = vpop.eup %249 }
 0x16c   :  { %v114_v21 = vmul.f32 %v250_v16, %v377_v24  ;;  %v115_v22 = vmul.f32 %v250_v16, %v379_v25  ;;  %v116_v23 = vmul.f32 %v250_v16, %v381_v26  ;;  %v117_v27 = vmul.f32 %v250_v16, %v383_v28 }
 0x16d   :  { %v118_v29 = vmul.f32 %v250_v16, %v74_v32  ;;  %v119_v30 = vmul.f32 %v250_v16, %v75_v38 }
 0x16e   :  { %v158_v34 = vmul.f32 %v131_v12, %v114_v21  ;;  %v159_v39 = vmul.f32 %v135_v13, %v115_v22  ;;  %v160_v44 = vmul.f32 %v139_v14, %v116_v23  ;;  %v161_v45 = vmul.f32 %v143_v15, %v117_v27 }
 0x16f   :  { %v252_v43 = vpop.eup %251  ;;  %v162_v47 = vmul.f32 %v147_v17, %v118_v29  ;;  %v163_v48 = vmul.f32 %v151_v18, %v119_v30 }
 0x170   :  { %v120_v24 = vmul.f32 %v252_v43, %v391_v35  ;;  %v121_v25 = vmul.f32 %v252_v43, %v393_v36  ;;  %v122_v26 = vmul.f32 %v252_v43, %v395_v37  ;;  %v123_v28 = vmul.f32 %v252_v43, %v399_v41 }
 0x171   :  { %v124_v32 = vmul.f32 %v252_v43, %v405_v46  ;;  %v125_v38 = vmul.f32 %v252_v43, %v81_v51  ;;  %v202_v49 = vadd.f32 %v175_v19, %v158_v34  ;;  %v203_v50 = vadd.f32 %v179_v20, %v159_v39 }
 0x172   :  { %v164_v52 = vmul.f32 %v131_v12, %v120_v24  ;;  %v165_v53 = vmul.f32 %v135_v13, %v121_v25  ;;  %v166_v54 = vmul.f32 %v139_v14, %v122_v26  ;;  %v167_v55 = vmul.f32 %v143_v15, %v123_v28 }
 0x173   :  { %v168_v56 = vmul.f32 %v147_v17, %v124_v32  ;;  %v169_v57 = vmul.f32 %v151_v18, %v125_v38  ;;  %v204_v35 = vadd.f32 %v183_v31, %v160_v44  ;;  %v205_v58 = vadd.f32 %v187_v33, %v161_v45  ;;  %214 = vst [vmem:[#allocation7] sm:$0xff] %v202_v49 }
 0x174   :  { %215 = vst [vmem:[#allocation7 + $0x8] sm:$0xff] %v203_v50  ;;  %v206_v36 = vadd.f32 %v191_v40, %v162_v47  ;;  %v207_v37 = vadd.f32 %v195_v42, %v163_v48  ;;  %v208_v41 = vadd.f32 %v175_v19, %v164_v52  ;;  %v209_v59 = vadd.f32 %v179_v20, %v165_v53 }
 0x175   :  { %v210_v46 = vadd.f32 %v183_v31, %v166_v54  ;;  %v211_v51 = vadd.f32 %v187_v33, %v167_v55  ;;  %v212_v60 = vadd.f32 %v191_v40, %v168_v56  ;;  %v213_v61 = vadd.f32 %v195_v42, %v169_v57  ;;  %216 = vst [vmem:[#allocation7 + $0x10] sm:$0xff] %v204_v35 }
 0x176   :  { %217 = vst [vmem:[#allocation7 + $0x18] sm:$0xff] %v205_v58  ;;  %218 = vst [vmem:[#allocation7 + $0x20] sm:$0xff] %v206_v36 }
 0x177   :  { %219 = vst [vmem:[#allocation7 + $0x28] sm:$0xff] %v207_v37  ;;  %220 = vst [vmem:[#allocation7 + $0x30] sm:$0xff] %v208_v41 }
 0x178   :  { %221 = vst [vmem:[#allocation7 + $0x38] sm:$0xff] %v209_v59  ;;  %222 = vst [vmem:[#allocation7 + $0x40] sm:$0xff] %v210_v46 }
 0x179   :  { %223 = vst [vmem:[#allocation7 + $0x48] sm:$0xff] %v211_v51  ;;  %224 = vst [vmem:[#allocation7 + $0x50] sm:$0xff] %v212_v60 }
 0x17a   :  { %225 = vst [vmem:[#allocation7 + $0x58] sm:$0xff] %v213_v61 }
 0x17b   :  { %308 = shalt.err (!%p305_p6)
}
 0x17c   :  { %s309_s15 = scalar_lea.hbm %s443_s3, 1536 }
 0x17d   :  { %p310_p7 = scmp.ne.s32.totalorder %s443_s3, %s309_s15  ;;  %p313_p8 = scmp.lt.u32.totalorder %s309_s15, %s443_s3 }
 0x17f   :  { %p315_p9 = pnand %p313_p8, %p310_p7 }
 0x181   :  { %318 = shalt.err (!%p315_p9)
}
 0x182   :  { %237 = dma.vmem_to_hbm [thread:$0]  %s232_s11, 1536, %s443_s3, [#allocation4], %s326_s22, %s326_s22, %s327_s23  }
 0x183   :  { %323 = dma.done.wait [#allocation4], 1536  }
 0x184   :  { %324 = vsyncadd [#allocation4], 4294965760 }
 0x185   :  { %241 = vsyncpa [#allocation3], 1 }
 0x186   :  { %242 = vsyncpa [#allocation6], 1 }
 0x187   :  { %243 = vsyncpa [#allocation4], 1 }

</bundles_post_ra>
